<compile_context>
chip_gen: v5e
topology: v5e:2x2
jax: 0.10.0
libtpu: 0.0.40
codegen_flags: <defaults>
</compile_context>

<pallas_src>
import jax
import jax.numpy as jnp
from jax import lax
from jax.experimental import pallas as pl
from jax.experimental.pallas import tpu as pltpu

TOKEN_BLOCK = 128   # tokens gathered per grid step (multiple of 8 for f32 tiles)
_DMA_UNROLL = 8     # DMA starts/waits per loop iteration (TOKEN_BLOCK % _DMA_UNROLL == 0)


def _embedding_kernel(ids_ref, table_hbm, out_ref, copy_sem):
    """Gather TOKEN_BLOCK embedding rows from HBM into the output tile via DMA.

    ids_ref   : SMEM (n_padded,) int32      -- scalar-prefetched token ids
    table_hbm : HBM  (vocab, embed)         -- full table, never staged in VMEM
    out_ref   : VMEM (TOKEN_BLOCK, embed)   -- output tile for this grid step
    copy_sem  : DMA semaphore shared by all row copies of this step
    """
    base = pl.program_id(0) * TOKEN_BLOCK

    def _issue(g, carry):
        start = g * _DMA_UNROLL
        for u in range(_DMA_UNROLL):                 # small static unroll
            j = start + u
            tok = ids_ref[base + j]
            pltpu.make_async_copy(
                table_hbm.at[pl.ds(tok, 1), :],      # 1 row from HBM
                out_ref.at[pl.ds(j, 1), :],          # lands directly in out tile
                copy_sem,
            ).start()
        return carry

    # Issue every row gather first so their latencies overlap, then wait.
    lax.fori_loop(0, TOKEN_BLOCK // _DMA_UNROLL, _issue, None)

    def _wait(g, carry):
        start = g * _DMA_UNROLL
        for u in range(_DMA_UNROLL):
            j = start + u
            pltpu.make_async_copy(
                table_hbm.at[pl.ds(0, 1), :],        # shape-only descriptor
                out_ref.at[pl.ds(j, 1), :],
                copy_sem,
            ).wait()
        return carry

    lax.fori_loop(0, TOKEN_BLOCK // _DMA_UNROLL, _wait, None)


def embedding_forward(ids, table):
    """ids: int (batch, seq); table: (vocab, embed) -> (batch, seq, embed)."""
    batch, seq = ids.shape
    vocab, embed = table.shape
    n_tokens = batch * seq
    n_blocks = pl.cdiv(n_tokens, TOKEN_BLOCK)
    n_padded = n_blocks * TOKEN_BLOCK

    flat_ids = ids.reshape(n_tokens).astype(jnp.int32)
    # The DMA gather has no runtime bounds check; clamp defensively
    # (torch.nn.Embedding would raise for out-of-range indices).
    flat_ids = jnp.clip(flat_ids, 0, vocab - 1)
    if n_padded != n_tokens:
        flat_ids = jnp.pad(flat_ids, (0, n_padded - n_tokens))  # pad with id 0

    dtype_bytes = jnp.dtype(table.dtype).itemsize
    cost = pl.CostEstimate(
        flops=0,
        transcendentals=0,
        bytes_accessed=2 * n_padded * embed * dtype_bytes + n_padded * 4,
    )

    out_flat = pl.pallas_call(
        _embedding_kernel,
        out_shape=jax.ShapeDtypeStruct((n_padded, embed), table.dtype),
        grid_spec=pltpu.PrefetchScalarGridSpec(
            num_scalar_prefetch=1,                      # flat_ids -> SMEM
            grid=(n_blocks,),
            in_specs=[
                # Table stays in HBM; rows are DMA-gathered per token.
                pl.BlockSpec(memory_space=pl.ANY),
            ],
            out_specs=pl.BlockSpec((TOKEN_BLOCK, embed), lambda i, ids: (i, 0)),
            scratch_shapes=[pltpu.SemaphoreType.DMA],
        ),
        compiler_params=pltpu.CompilerParams(
            dimension_semantics=("parallel",),          # disjoint tiles -> 2 TCs on v7x
        ),
        cost_estimate=cost,
    )(flat_ids, table)

    return out_flat[:n_tokens].reshape(batch, seq, embed)


if __name__ == "__main__":
    vocab_size = 32
    embedding_size = 128
    batch, seq = 2, 8

    key = jax.random.PRNGKey(0)
    k_table, k_ids = jax.random.split(key)

    # nn.Embedding default init: weight ~ N(0, 1)
    table = jax.random.normal(k_table, (vocab_size, embedding_size), dtype=jnp.float32)
    ids = jax.random.randint(k_ids, (batch, seq), 0, vocab_size, dtype=jnp.int32)

    out = embedding_forward(ids, table)
    jax.block_until_ready(out)

    # Reference check against plain JAX gather (== torch nn.Embedding forward).
    ref = table[ids]
    assert out.shape == (batch, seq, embedding_size)
    assert jnp.allclose(out, ref), "Pallas embedding mismatch vs reference"

    print("KERNEL_OK")
</pallas_src>

<mosaic_0001>
module attributes {stable_mosaic.version = 11 : i64} {
  func.func @_embedding_kernel(%arg0: i32, %arg1: memref<128xi32, #tpu.memory_space<smem>>, %arg2: memref<32x128xf32, #tpu.memory_space<any>>, %arg3: memref<128x128xf32, #tpu.memory_space<vmem>>, %arg4: memref<!tpu.dma_semaphore, #tpu.memory_space<semaphore_mem>>) attributes {dimension_semantics = [#tpu.dimension_semantics<parallel>], iteration_bounds = array<i64: 1>, scalar_prefetch = 1 : i64, scratch_operands = 1 : i64, tpu.core_type = #tpu.core_type<tc>, window_params = [{}, {transform_indices = @transform_1, window_bounds = array<i64: 128, 128>}]} {
    %c128_i32 = arith.constant 128 : i32
    %0 = arith.muli %arg0, %c128_i32 : i32
    %c0_i32 = arith.constant 0 : i32
    %c16_i32 = arith.constant 16 : i32
    %1 = arith.addi %c0_i32, %c16_i32 : i32
    %c1_i32 = arith.constant 1 : i32
    scf.for %arg5 = %c0_i32 to %1 step %c1_i32  : i32 {
      %c8_i32 = arith.constant 8 : i32
      %3 = arith.muli %arg5, %c8_i32 : i32
      %c0_i32_5 = arith.constant 0 : i32
      %4 = arith.addi %3, %c0_i32_5 : i32
      %5 = arith.addi %0, %4 : i32
      %6 = arith.index_cast %5 : i32 to index
      %7 = memref.load %arg1[%6] : memref<128xi32, #tpu.memory_space<smem>>
      %c0_i32_6 = arith.constant 0 : i32
      %8 = tpu.memref_slice %arg2[%7, %c0_i32_6] : memref<32x128xf32, #tpu.memory_space<any>> -> memref<1x128xf32, #tpu.memory_space<any>>
      %c0_i32_7 = arith.constant 0 : i32
      %9 = tpu.memref_slice %arg3[%4, %c0_i32_7] : memref<128x128xf32, #tpu.memory_space<vmem>> -> memref<1x128xf32, #tpu.memory_space<vmem>>
      tpu.enqueue_dma source(%8 : memref<1x128xf32, #tpu.memory_space<any>>) target(%9 : memref<1x128xf32, #tpu.memory_space<vmem>>) target_semaphore(%arg4 : memref<!tpu.dma_semaphore, #tpu.memory_space<semaphore_mem>>)
      %c1_i32_8 = arith.constant 1 : i32
      %10 = arith.addi %3, %c1_i32_8 : i32
      %11 = arith.addi %0, %10 : i32
      %12 = arith.index_cast %11 : i32 to index
      %13 = memref.load %arg1[%12] : memref<128xi32, #tpu.memory_space<smem>>
      %c0_i32_9 = arith.constant 0 : i32
      %14 = tpu.memref_slice %arg2[%13, %c0_i32_9] : memref<32x128xf32, #tpu.memory_space<any>> -> memref<1x128xf32, #tpu.memory_space<any>>
      %c0_i32_10 = arith.constant 0 : i32
      %15 = tpu.memref_slice %arg3[%10, %c0_i32_10] : memref<128x128xf32, #tpu.memory_space<vmem>> -> memref<1x128xf32, #tpu.memory_space<vmem>>
      tpu.enqueue_dma source(%14 : memref<1x128xf32, #tpu.memory_space<any>>) target(%15 : memref<1x128xf32, #tpu.memory_space<vmem>>) target_semaphore(%arg4 : memref<!tpu.dma_semaphore, #tpu.memory_space<semaphore_mem>>)
      %c2_i32 = arith.constant 2 : i32
      %16 = arith.addi %3, %c2_i32 : i32
      %17 = arith.addi %0, %16 : i32
      %18 = arith.index_cast %17 : i32 to index
      %19 = memref.load %arg1[%18] : memref<128xi32, #tpu.memory_space<smem>>
      %c0_i32_11 = arith.constant 0 : i32
      %20 = tpu.memref_slice %arg2[%19, %c0_i32_11] : memref<32x128xf32, #tpu.memory_space<any>> -> memref<1x128xf32, #tpu.memory_space<any>>
      %c0_i32_12 = arith.constant 0 : i32
      %21 = tpu.memref_slice %arg3[%16, %c0_i32_12] : memref<128x128xf32, #tpu.memory_space<vmem>> -> memref<1x128xf32, #tpu.memory_space<vmem>>
      tpu.enqueue_dma source(%20 : memref<1x128xf32, #tpu.memory_space<any>>) target(%21 : memref<1x128xf32, #tpu.memory_space<vmem>>) target_semaphore(%arg4 : memref<!tpu.dma_semaphore, #tpu.memory_space<semaphore_mem>>)
      %c3_i32 = arith.constant 3 : i32
      %22 = arith.addi %3, %c3_i32 : i32
      %23 = arith.addi %0, %22 : i32
      %24 = arith.index_cast %23 : i32 to index
      %25 = memref.load %arg1[%24] : memref<128xi32, #tpu.memory_space<smem>>
      %c0_i32_13 = arith.constant 0 : i32
      %26 = tpu.memref_slice %arg2[%25, %c0_i32_13] : memref<32x128xf32, #tpu.memory_space<any>> -> memref<1x128xf32, #tpu.memory_space<any>>
      %c0_i32_14 = arith.constant 0 : i32
      %27 = tpu.memref_slice %arg3[%22, %c0_i32_14] : memref<128x128xf32, #tpu.memory_space<vmem>> -> memref<1x128xf32, #tpu.memory_space<vmem>>
      tpu.enqueue_dma source(%26 : memref<1x128xf32, #tpu.memory_space<any>>) target(%27 : memref<1x128xf32, #tpu.memory_space<vmem>>) target_semaphore(%arg4 : memref<!tpu.dma_semaphore, #tpu.memory_space<semaphore_mem>>)
      %c4_i32 = arith.constant 4 : i32
      %28 = arith.addi %3, %c4_i32 : i32
      %29 = arith.addi %0, %28 : i32
      %30 = arith.index_cast %29 : i32 to index
      %31 = memref.load %arg1[%30] : memref<128xi32, #tpu.memory_space<smem>>
      %c0_i32_15 = arith.constant 0 : i32
      %32 = tpu.memref_slice %arg2[%31, %c0_i32_15] : memref<32x128xf32, #tpu.memory_space<any>> -> memref<1x128xf32, #tpu.memory_space<any>>
      %c0_i32_16 = arith.constant 0 : i32
      %33 = tpu.memref_slice %arg3[%28, %c0_i32_16] : memref<128x128xf32, #tpu.memory_space<vmem>> -> memref<1x128xf32, #tpu.memory_space<vmem>>
      tpu.enqueue_dma source(%32 : memref<1x128xf32, #tpu.memory_space<any>>) target(%33 : memref<1x128xf32, #tpu.memory_space<vmem>>) target_semaphore(%arg4 : memref<!tpu.dma_semaphore, #tpu.memory_space<semaphore_mem>>)
      %c5_i32 = arith.constant 5 : i32
      %34 = arith.addi %3, %c5_i32 : i32
      %35 = arith.addi %0, %34 : i32
      %36 = arith.index_cast %35 : i32 to index
      %37 = memref.load %arg1[%36] : memref<128xi32, #tpu.memory_space<smem>>
      %c0_i32_17 = arith.constant 0 : i32
      %38 = tpu.memref_slice %arg2[%37, %c0_i32_17] : memref<32x128xf32, #tpu.memory_space<any>> -> memref<1x128xf32, #tpu.memory_space<any>>
      %c0_i32_18 = arith.constant 0 : i32
      %39 = tpu.memref_slice %arg3[%34, %c0_i32_18] : memref<128x128xf32, #tpu.memory_space<vmem>> -> memref<1x128xf32, #tpu.memory_space<vmem>>
      tpu.enqueue_dma source(%38 : memref<1x128xf32, #tpu.memory_space<any>>) target(%39 : memref<1x128xf32, #tpu.memory_space<vmem>>) target_semaphore(%arg4 : memref<!tpu.dma_semaphore, #tpu.memory_space<semaphore_mem>>)
      %c6_i32 = arith.constant 6 : i32
      %40 = arith.addi %3, %c6_i32 : i32
      %41 = arith.addi %0, %40 : i32
      %42 = arith.index_cast %41 : i32 to index
      %43 = memref.load %arg1[%42] : memref<128xi32, #tpu.memory_space<smem>>
      %c0_i32_19 = arith.constant 0 : i32
      %44 = tpu.memref_slice %arg2[%43, %c0_i32_19] : memref<32x128xf32, #tpu.memory_space<any>> -> memref<1x128xf32, #tpu.memory_space<any>>
      %c0_i32_20 = arith.constant 0 : i32
      %45 = tpu.memref_slice %arg3[%40, %c0_i32_20] : memref<128x128xf32, #tpu.memory_space<vmem>> -> memref<1x128xf32, #tpu.memory_space<vmem>>
      tpu.enqueue_dma source(%44 : memref<1x128xf32, #tpu.memory_space<any>>) target(%45 : memref<1x128xf32, #tpu.memory_space<vmem>>) target_semaphore(%arg4 : memref<!tpu.dma_semaphore, #tpu.memory_space<semaphore_mem>>)
      %c7_i32 = arith.constant 7 : i32
      %46 = arith.addi %3, %c7_i32 : i32
      %47 = arith.addi %0, %46 : i32
      %48 = arith.index_cast %47 : i32 to index
      %49 = memref.load %arg1[%48] : memref<128xi32, #tpu.memory_space<smem>>
      %c0_i32_21 = arith.constant 0 : i32
      %50 = tpu.memref_slice %arg2[%49, %c0_i32_21] : memref<32x128xf32, #tpu.memory_space<any>> -> memref<1x128xf32, #tpu.memory_space<any>>
      %c0_i32_22 = arith.constant 0 : i32
      %51 = tpu.memref_slice %arg3[%46, %c0_i32_22] : memref<128x128xf32, #tpu.memory_space<vmem>> -> memref<1x128xf32, #tpu.memory_space<vmem>>
      tpu.enqueue_dma source(%50 : memref<1x128xf32, #tpu.memory_space<any>>) target(%51 : memref<1x128xf32, #tpu.memory_space<vmem>>) target_semaphore(%arg4 : memref<!tpu.dma_semaphore, #tpu.memory_space<semaphore_mem>>)
    }
    %c16_i32_0 = arith.constant 16 : i32
    %c0_i32_1 = arith.constant 0 : i32
    %c16_i32_2 = arith.constant 16 : i32
    %2 = arith.addi %c0_i32_1, %c16_i32_2 : i32
    %c1_i32_3 = arith.constant 1 : i32
    scf.for %arg5 = %c0_i32_1 to %2 step %c1_i32_3  : i32 {
      %c8_i32 = arith.constant 8 : i32
      %3 = arith.muli %arg5, %c8_i32 : i32
      %c0_i32_5 = arith.constant 0 : i32
      %4 = arith.addi %3, %c0_i32_5 : i32
      %c0_i32_6 = arith.constant 0 : i32
      %c0_i32_7 = arith.constant 0 : i32
      %5 = tpu.memref_slice %arg2[%c0_i32_6, %c0_i32_7] : memref<32x128xf32, #tpu.memory_space<any>> -> memref<1x128xf32, #tpu.memory_space<any>>
      %c0_i32_8 = arith.constant 0 : i32
      %6 = tpu.memref_slice %arg3[%4, %c0_i32_8] : memref<128x128xf32, #tpu.memory_space<vmem>> -> memref<1x128xf32, #tpu.memory_space<vmem>>
      tpu.wait_dma2 semaphore(%arg4 : memref<!tpu.dma_semaphore, #tpu.memory_space<semaphore_mem>>) src(%5 : memref<1x128xf32, #tpu.memory_space<any>>) dst(%6 : memref<1x128xf32, #tpu.memory_space<vmem>>)
      %c1_i32_9 = arith.constant 1 : i32
      %7 = arith.addi %3, %c1_i32_9 : i32
      %c0_i32_10 = arith.constant 0 : i32
      %c0_i32_11 = arith.constant 0 : i32
      %8 = tpu.memref_slice %arg2[%c0_i32_10, %c0_i32_11] : memref<32x128xf32, #tpu.memory_space<any>> -> memref<1x128xf32, #tpu.memory_space<any>>
      %c0_i32_12 = arith.constant 0 : i32
      %9 = tpu.memref_slice %arg3[%7, %c0_i32_12] : memref<128x128xf32, #tpu.memory_space<vmem>> -> memref<1x128xf32, #tpu.memory_space<vmem>>
      tpu.wait_dma2 semaphore(%arg4 : memref<!tpu.dma_semaphore, #tpu.memory_space<semaphore_mem>>) src(%8 : memref<1x128xf32, #tpu.memory_space<any>>) dst(%9 : memref<1x128xf32, #tpu.memory_space<vmem>>)
      %c2_i32 = arith.constant 2 : i32
      %10 = arith.addi %3, %c2_i32 : i32
      %c0_i32_13 = arith.constant 0 : i32
      %c0_i32_14 = arith.constant 0 : i32
      %11 = tpu.memref_slice %arg2[%c0_i32_13, %c0_i32_14] : memref<32x128xf32, #tpu.memory_space<any>> -> memref<1x128xf32, #tpu.memory_space<any>>
      %c0_i32_15 = arith.constant 0 : i32
      %12 = tpu.memref_slice %arg3[%10, %c0_i32_15] : memref<128x128xf32, #tpu.memory_space<vmem>> -> memref<1x128xf32, #tpu.memory_space<vmem>>
      tpu.wait_dma2 semaphore(%arg4 : memref<!tpu.dma_semaphore, #tpu.memory_space<semaphore_mem>>) src(%11 : memref<1x128xf32, #tpu.memory_space<any>>) dst(%12 : memref<1x128xf32, #tpu.memory_space<vmem>>)
      %c3_i32 = arith.constant 3 : i32
      %13 = arith.addi %3, %c3_i32 : i32
      %c0_i32_16 = arith.constant 0 : i32
      %c0_i32_17 = arith.constant 0 : i32
      %14 = tpu.memref_slice %arg2[%c0_i32_16, %c0_i32_17] : memref<32x128xf32, #tpu.memory_space<any>> -> memref<1x128xf32, #tpu.memory_space<any>>
      %c0_i32_18 = arith.constant 0 : i32
      %15 = tpu.memref_slice %arg3[%13, %c0_i32_18] : memref<128x128xf32, #tpu.memory_space<vmem>> -> memref<1x128xf32, #tpu.memory_space<vmem>>
      tpu.wait_dma2 semaphore(%arg4 : memref<!tpu.dma_semaphore, #tpu.memory_space<semaphore_mem>>) src(%14 : memref<1x128xf32, #tpu.memory_space<any>>) dst(%15 : memref<1x128xf32, #tpu.memory_space<vmem>>)
      %c4_i32 = arith.constant 4 : i32
      %16 = arith.addi %3, %c4_i32 : i32
      %c0_i32_19 = arith.constant 0 : i32
      %c0_i32_20 = arith.constant 0 : i32
      %17 = tpu.memref_slice %arg2[%c0_i32_19, %c0_i32_20] : memref<32x128xf32, #tpu.memory_space<any>> -> memref<1x128xf32, #tpu.memory_space<any>>
      %c0_i32_21 = arith.constant 0 : i32
      %18 = tpu.memref_slice %arg3[%16, %c0_i32_21] : memref<128x128xf32, #tpu.memory_space<vmem>> -> memref<1x128xf32, #tpu.memory_space<vmem>>
      tpu.wait_dma2 semaphore(%arg4 : memref<!tpu.dma_semaphore, #tpu.memory_space<semaphore_mem>>) src(%17 : memref<1x128xf32, #tpu.memory_space<any>>) dst(%18 : memref<1x128xf32, #tpu.memory_space<vmem>>)
      %c5_i32 = arith.constant 5 : i32
      %19 = arith.addi %3, %c5_i32 : i32
      %c0_i32_22 = arith.constant 0 : i32
      %c0_i32_23 = arith.constant 0 : i32
      %20 = tpu.memref_slice %arg2[%c0_i32_22, %c0_i32_23] : memref<32x128xf32, #tpu.memory_space<any>> -> memref<1x128xf32, #tpu.memory_space<any>>
      %c0_i32_24 = arith.constant 0 : i32
      %21 = tpu.memref_slice %arg3[%19, %c0_i32_24] : memref<128x128xf32, #tpu.memory_space<vmem>> -> memref<1x128xf32, #tpu.memory_space<vmem>>
      tpu.wait_dma2 semaphore(%arg4 : memref<!tpu.dma_semaphore, #tpu.memory_space<semaphore_mem>>) src(%20 : memref<1x128xf32, #tpu.memory_space<any>>) dst(%21 : memref<1x128xf32, #tpu.memory_space<vmem>>)
      %c6_i32 = arith.constant 6 : i32
      %22 = arith.addi %3, %c6_i32 : i32
      %c0_i32_25 = arith.constant 0 : i32
      %c0_i32_26 = arith.constant 0 : i32
      %23 = tpu.memref_slice %arg2[%c0_i32_25, %c0_i32_26] : memref<32x128xf32, #tpu.memory_space<any>> -> memref<1x128xf32, #tpu.memory_space<any>>
      %c0_i32_27 = arith.constant 0 : i32
      %24 = tpu.memref_slice %arg3[%22, %c0_i32_27] : memref<128x128xf32, #tpu.memory_space<vmem>> -> memref<1x128xf32, #tpu.memory_space<vmem>>
      tpu.wait_dma2 semaphore(%arg4 : memref<!tpu.dma_semaphore, #tpu.memory_space<semaphore_mem>>) src(%23 : memref<1x128xf32, #tpu.memory_space<any>>) dst(%24 : memref<1x128xf32, #tpu.memory_space<vmem>>)
      %c7_i32 = arith.constant 7 : i32
      %25 = arith.addi %3, %c7_i32 : i32
      %c0_i32_28 = arith.constant 0 : i32
      %c0_i32_29 = arith.constant 0 : i32
      %26 = tpu.memref_slice %arg2[%c0_i32_28, %c0_i32_29] : memref<32x128xf32, #tpu.memory_space<any>> -> memref<1x128xf32, #tpu.memory_space<any>>
      %c0_i32_30 = arith.constant 0 : i32
      %27 = tpu.memref_slice %arg3[%25, %c0_i32_30] : memref<128x128xf32, #tpu.memory_space<vmem>> -> memref<1x128xf32, #tpu.memory_space<vmem>>
      tpu.wait_dma2 semaphore(%arg4 : memref<!tpu.dma_semaphore, #tpu.memory_space<semaphore_mem>>) src(%26 : memref<1x128xf32, #tpu.memory_space<any>>) dst(%27 : memref<1x128xf32, #tpu.memory_space<vmem>>)
    }
    %c16_i32_4 = arith.constant 16 : i32
    return
  }
  func.func @transform_1(%arg0: i32, %arg1: memref<128xi32, #tpu.memory_space<smem>>) -> (i32, i32) {
    %c0_i32 = arith.constant 0 : i32
    %c0_i32_0 = arith.constant 0 : i32
    return %arg0, %c0_i32 : i32, i32
  }
}

</mosaic_0001>

<bundles_post_ra>
// kernel: tpu_custom_call.1
= control target key start
LH: loop header
LB: loop body
LE: loop exit
PB: predicated region body
PF: predicated region fallthrough
CT: control target
= control target key end

     0   :  { %s534_s12 = smov [#allocation4]   ;;  %s728_s0 = inlined_call_operand.hbm [shape: s32[128], index: 0, kind: input, shape index: {}]   ;;  %s729_s1 = inlined_call_operand.hbm [shape: f32[32,128], index: 1, kind: input, shape index: {}]   ;;  %s730_s2 = inlined_call_operand.hbm [shape: f32[128,128], index: 2, kind: output, shape index: {}]  }
   0x1   :  { %s8_s11 = sshll.u32 %s728_s0, 4  ;;  %s9_s11 = int_to_ptr.hbm [resolvable:$true] %s8_s11 }
   0x2   :  { %11 = dma.hbm_to_smem %s9_s11, 16, %s534_s12, [#allocation3] }
   0x3   :  { %520 = dma.done.wait [#allocation3], 16 }
   0x4   :  { %521 = vsyncadd [#allocation3], 4294967280 }
   0x5   :  { %14 = sfence }
   0x6   :  { %15 = vsyncpa [#allocation6], 0  ;;  %s557_s13 = smov 0  }
   0x7 LB: > { %s563_s14 = sshll.u32 %s528_s13, 3  ;;  %s596_s8 = scalar_lea.hbm %s729_s1, 32  ;;  %s528_s13 = sphi %s557_s13, %s22_s13  }
   0x8   : > { %s25_s0 = sld [smem:[#allocation4 + %s563_s14]]  ;;  %s567_s15 = scalar_lea.vmem [#allocation5], %s563_s14 }
   0x9   : > { %s37_s16 = sshll.u32 %s567_s15, 4  ;;  %s41_s17 = sadd.s32 1, %s563_s14  ;;  %s571_s16 = int_to_ptr.vmem [resolvable:$true] %s37_s16 }
   0xa   : > { %s573_s18 = sld [smem:[#allocation4 + %s41_s17]]  ;;  %s220_s19 = scalar_lea.vmem %s567_s15, 1 [#allocation5] }
   0xb   : > { %s59_s20 = sadd.s32 2, %s563_s14  ;;  %s577_s21 = sshll.u32 %s220_s19, 4  ;;  %s56_s21 = int_to_ptr.vmem [resolvable:$true] %s577_s21 }
   0xc   : > { %s579_s22 = sld [smem:[#allocation4 + %s59_s20]]  ;;  %s224_s23 = scalar_lea.vmem %s567_s15, 2 [#allocation5] }
   0xd   : > { %s586_s27 = sshll.u32 %s224_s23, 4  ;;  %s74_s27 = int_to_ptr.vmem [resolvable:$true] %s586_s27 }
   0xe   : > { %s26_s26 = scalar_lea.hbm %s729_s1, %s25_s0 }
   0xf   : > { %s35_s28 = sshll.u32 %s26_s26, 4  ;;  %s36_s28 = int_to_ptr.hbm [resolvable:$true] %s35_s28 }
  0x10   : > { %s44_s3 = scalar_lea.hbm %s729_s1, %s573_s18  ;;  %s296_s4 = sshra.s32 %s36_s28, 4  ;;  %s297_s4 = int_to_ptr.hbm [resolvable:$true] %s296_s4 }
  0x11   : > { %s298_s5 = scalar_lea.hbm %s297_s4, 1  ;;  %p301_p1 = scmp.lt.s32.totalorder %s297_s4, %s729_s1 }
  0x12   : > { %p299_p0 = scmp.ne.s32.totalorder %s297_s4, %s298_s5  ;;  %p302_p2 = scmp.lt.s32.totalorder %s596_s8, %s298_s5 }
  0x14   : > { %p303_p3 = por %p302_p2, %p301_p1 }
  0x16   : > { %p304_p4 = pnand %p303_p3, %p299_p0 }
  0x18   : > { %307 = shalt.err (!%p304_p4)  }
  0x19   : > { %s308_s11 = sshra.s32 %s571_s16, 4  ;;  %s535_s0 = smov [#allocation5]   ;;  %s309_s11 = int_to_ptr.vmem [resolvable:$true] %s308_s11 }
  0x1a   : > { %s310_s12 = scalar_lea.vmem %s309_s11, 1  ;;  %s603_s17 = scalar_lea.vmem %s535_s0, 128 }
  0x1b   : > { %p311_p5 = scmp.ne.s32.totalorder %s309_s11, %s310_s12  ;;  %p313_p6 = scmp.lt.s32.totalorder %s309_s11, [#allocation5] }
  0x1c   : > { %p314_p7 = scmp.lt.s32.totalorder %s603_s17, %s310_s12 }
  0x1e   : > { %p315_p8 = por %p314_p7, %p313_p6 }
  0x20   : > { %p316_p9 = pnand %p315_p8, %p311_p5 }
  0x22   : > { %319 = shalt.err (!%p316_p9)  }
  0x23   : > { %40 = dma.hbm_to_vmem [thread:$0]  %s36_s28, 16, %s571_s16, [#allocation2] }
  0x24   : > { %s53_s18 = sshll.u32 %s44_s3, 4  ;;  %s62_s23 = scalar_lea.hbm %s729_s1, %s579_s22  ;;  %s54_s18 = int_to_ptr.hbm [resolvable:$true] %s53_s18 }
  0x25   : > { %s611_s24 = sshll.u32 %s62_s23, 4  ;;  %s320_s25 = sshra.s32 %s54_s18, 4  ;;  %s321_s25 = int_to_ptr.hbm [resolvable:$true] %s320_s25  ;;  %s72_s24 = int_to_ptr.hbm [resolvable:$true] %s611_s24 }
  0x26   : > { %s322_s26 = scalar_lea.hbm %s321_s25, 1  ;;  %p325_p11 = scmp.lt.s32.totalorder %s321_s25, %s729_s1 }
  0x27   : > { %p323_p10 = scmp.ne.s32.totalorder %s321_s25, %s322_s26  ;;  %p326_p12 = scmp.lt.s32.totalorder %s596_s8, %s322_s26 }
  0x29   : > { %p327_p13 = por %p326_p12, %p325_p11 }
  0x2b   : > { %p328_p0 = pnand %p327_p13, %p323_p10 }
  0x2d   : > { %331 = shalt.err (!%p328_p0)  }
  0x2e   : > { %s332_s16 = sshra.s32 %s56_s21, 4  ;;  %s333_s16 = int_to_ptr.vmem [resolvable:$true] %s332_s16 }
  0x2f   : > { %s334_s22 = scalar_lea.vmem %s333_s16, 1  ;;  %p337_p2 = scmp.lt.s32.totalorder %s333_s16, [#allocation5] }
  0x30   : > { %p335_p1 = scmp.ne.s32.totalorder %s333_s16, %s334_s22  ;;  %p338_p3 = scmp.lt.s32.totalorder %s603_s17, %s334_s22 }
  0x32   : > { %p339_p4 = por %p338_p3, %p337_p2 }
  0x34   : > { %p340_p5 = pnand %p339_p4, %p335_p1 }
  0x36   : > { %343 = shalt.err (!%p340_p5)  }
  0x37   : > { %58 = dma.hbm_to_vmem [thread:$0]  %s54_s18, 16, %s56_s21, [#allocation2] }
  0x38   : > { %s77_s28 = sadd.s32 3, %s563_s14  ;;  %s344_s3 = sshra.s32 %s72_s24, 4  ;;  %s345_s3 = int_to_ptr.hbm [resolvable:$true] %s344_s3 }
  0x39   : > { %s346_s4 = scalar_lea.hbm %s345_s3, 1  ;;  %p349_p7 = scmp.lt.s32.totalorder %s345_s3, %s729_s1 }
  0x3a   : > { %p347_p6 = scmp.ne.s32.totalorder %s345_s3, %s346_s4  ;;  %p350_p8 = scmp.lt.s32.totalorder %s596_s8, %s346_s4 }
  0x3c   : > { %p351_p9 = por %p350_p8, %p349_p7 }
  0x3e   : > { %p352_p10 = pnand %p351_p9, %p347_p6 }
  0x40   : > { %355 = shalt.err (!%p352_p10)  }
  0x41   : > { %s356_s7 = sshra.s32 %s74_s27, 4  ;;  %s357_s7 = int_to_ptr.vmem [resolvable:$true] %s356_s7 }
  0x42   : > { %s358_s21 = scalar_lea.vmem %s357_s7, 1  ;;  %p361_p12 = scmp.lt.s32.totalorder %s357_s7, [#allocation5] }
  0x43   : > { %p359_p11 = scmp.ne.s32.totalorder %s357_s7, %s358_s21  ;;  %p362_p13 = scmp.lt.s32.totalorder %s603_s17, %s358_s21 }
  0x45   : > { %p363_p0 = por %p362_p13, %p361_p12 }
  0x47   : > { %p364_p1 = pnand %p363_p0, %p359_p11 }
  0x49   : > { %367 = shalt.err (!%p364_p1)  }
  0x4a   : > { %76 = dma.hbm_to_vmem [thread:$0]  %s72_s24, 16, %s74_s27, [#allocation2] }
  0x4b   : > { %s79_s9 = sld [smem:[#allocation4 + %s77_s28]]  ;;  %s228_s10 = scalar_lea.vmem %s567_s15, 3 [#allocation5] }
  0x4c   : > { %s634_s11 = sshll.u32 %s228_s10, 4  ;;  %s95_s12 = sadd.s32 4, %s563_s14  ;;  %s92_s11 = int_to_ptr.vmem [resolvable:$true] %s634_s11 }
  0x4d   : > { %s638_s0 = sld [smem:[#allocation4 + %s95_s12]]  ;;  %s232_s18 = scalar_lea.vmem %s567_s15, 4 [#allocation5] }
  0x4e   : > { %s113_s19 = sadd.s32 5, %s563_s14  ;;  %s642_s20 = sshll.u32 %s232_s18, 4  ;;  %s110_s20 = int_to_ptr.vmem [resolvable:$true] %s642_s20 }
  0x4f   : > { %s644_s23 = sld [smem:[#allocation4 + %s113_s19]]  ;;  %s236_s27 = scalar_lea.vmem %s567_s15, 5 [#allocation5] }
  0x50   : > { %s651_s29 = sshll.u32 %s236_s27, 4  ;;  %s128_s29 = int_to_ptr.vmem [resolvable:$true] %s651_s29 }
  0x51   : > { %s80_s26 = scalar_lea.hbm %s729_s1, %s79_s9 }
  0x52   : > { %s89_s30 = sshll.u32 %s80_s26, 4  ;;  %s90_s30 = int_to_ptr.hbm [resolvable:$true] %s89_s30 }
  0x53   : > { %s98_s28 = scalar_lea.hbm %s729_s1, %s638_s0  ;;  %s368_s3 = sshra.s32 %s90_s30, 4  ;;  %s369_s3 = int_to_ptr.hbm [resolvable:$true] %s368_s3 }
  0x54   : > { %s370_s4 = scalar_lea.hbm %s369_s3, 1  ;;  %p373_p3 = scmp.lt.s32.totalorder %s369_s3, %s729_s1 }
  0x55   : > { %p371_p2 = scmp.ne.s32.totalorder %s369_s3, %s370_s4  ;;  %p374_p4 = scmp.lt.s32.totalorder %s596_s8, %s370_s4 }
  0x57   : > { %p375_p5 = por %p374_p4, %p373_p3 }
  0x59   : > { %p376_p6 = pnand %p375_p5, %p371_p2 }
  0x5b   : > { %379 = shalt.err (!%p376_p6)  }
  0x5c   : > { %s380_s7 = sshra.s32 %s92_s11, 4  ;;  %s381_s7 = int_to_ptr.vmem [resolvable:$true] %s380_s7 }
  0x5d   : > { %s382_s21 = scalar_lea.vmem %s381_s7, 1  ;;  %p385_p8 = scmp.lt.s32.totalorder %s381_s7, [#allocation5] }
  0x5e   : > { %p383_p7 = scmp.ne.s32.totalorder %s381_s7, %s382_s21  ;;  %p386_p9 = scmp.lt.s32.totalorder %s603_s17, %s382_s21 }
  0x60   : > { %p387_p10 = por %p386_p9, %p385_p8 }
  0x62   : > { %p388_p11 = pnand %p387_p10, %p383_p7 }
  0x64   : > { %391 = shalt.err (!%p388_p11)  }
  0x65   : > { %94 = dma.hbm_to_vmem [thread:$0]  %s90_s30, 16, %s92_s11, [#allocation2] }
  0x66   : > { %s107_s9 = sshll.u32 %s98_s28, 4  ;;  %s116_s0 = scalar_lea.hbm %s729_s1, %s644_s23  ;;  %s108_s9 = int_to_ptr.hbm [resolvable:$true] %s107_s9 }
  0x67   : > { %s671_s18 = sshll.u32 %s116_s0, 4  ;;  %s392_s19 = sshra.s32 %s108_s9, 4  ;;  %s393_s19 = int_to_ptr.hbm [resolvable:$true] %s392_s19  ;;  %s126_s18 = int_to_ptr.hbm [resolvable:$true] %s671_s18 }
  0x68   : > { %s394_s27 = scalar_lea.hbm %s393_s19, 1  ;;  %p397_p13 = scmp.lt.s32.totalorder %s393_s19, %s729_s1 }
  0x69   : > { %p395_p12 = scmp.ne.s32.totalorder %s393_s19, %s394_s27  ;;  %p398_p0 = scmp.lt.s32.totalorder %s596_s8, %s394_s27 }
  0x6b   : > { %p399_p1 = por %p398_p0, %p397_p13 }
  0x6d   : > { %p400_p2 = pnand %p399_p1, %p395_p12 }
  0x6f   : > { %403 = shalt.err (!%p400_p2)  }
  0x70   : > { %s404_s11 = sshra.s32 %s110_s20, 4  ;;  %s405_s11 = int_to_ptr.vmem [resolvable:$true] %s404_s11 }
  0x71   : > { %s406_s23 = scalar_lea.vmem %s405_s11, 1  ;;  %p409_p4 = scmp.lt.s32.totalorder %s405_s11, [#allocation5] }
  0x72   : > { %p407_p3 = scmp.ne.s32.totalorder %s405_s11, %s406_s23  ;;  %p410_p5 = scmp.lt.s32.totalorder %s603_s17, %s406_s23 }
  0x74   : > { %p411_p6 = por %p410_p5, %p409_p4 }
  0x76   : > { %p412_p7 = pnand %p411_p6, %p407_p3 }
  0x78   : > { %415 = shalt.err (!%p412_p7)  }
  0x79   : > { %112 = dma.hbm_to_vmem [thread:$0]  %s108_s9, 16, %s110_s20, [#allocation2] }
  0x7a   : > { %s131_s26 = sadd.s32 6, %s563_s14  ;;  %s416_s30 = sshra.s32 %s126_s18, 4  ;;  %s417_s30 = int_to_ptr.hbm [resolvable:$true] %s416_s30 }
  0x7b   : > { %s418_s16 = scalar_lea.hbm %s417_s30, 1  ;;  %p421_p9 = scmp.lt.s32.totalorder %s417_s30, %s729_s1 }
  0x7c   : > { %p419_p8 = scmp.ne.s32.totalorder %s417_s30, %s418_s16  ;;  %p422_p10 = scmp.lt.s32.totalorder %s596_s8, %s418_s16 }
  0x7e   : > { %p423_p11 = por %p422_p10, %p421_p9 }
  0x80   : > { %p424_p12 = pnand %p423_p11, %p419_p8 }
  0x82   : > { %427 = shalt.err (!%p424_p12)  }
  0x83   : > { %s428_s3 = sshra.s32 %s128_s29, 4  ;;  %s429_s3 = int_to_ptr.vmem [resolvable:$true] %s428_s3 }
  0x84   : > { %s430_s20 = scalar_lea.vmem %s429_s3, 1  ;;  %p433_p0 = scmp.lt.s32.totalorder %s429_s3, [#allocation5] }
  0x85   : > { %p431_p13 = scmp.ne.s32.totalorder %s429_s3, %s430_s20  ;;  %p434_p1 = scmp.lt.s32.totalorder %s603_s17, %s430_s20 }
  0x87   : > { %p435_p2 = por %p434_p1, %p433_p0 }
  0x89   : > { %p436_p3 = pnand %p435_p2, %p431_p13 }
  0x8b   : > { %439 = shalt.err (!%p436_p3)  }
  0x8c   : > { %130 = dma.hbm_to_vmem [thread:$0]  %s126_s18, 16, %s128_s29, [#allocation2] }
  0x8d   : > { %s133_s4 = sld [smem:[#allocation4 + %s131_s26]]  ;;  %s240_s5 = scalar_lea.vmem %s567_s15, 6 [#allocation5] }
  0x8e   : > { %s149_s6 = sadd.s32 7, %s563_s14  ;;  %s145_s21 = sshll.u32 %s240_s5, 4  ;;  %s146_s21 = int_to_ptr.vmem [resolvable:$true] %s145_s21 }
  0x8f   : > { %s695_s7 = sld [smem:[#allocation4 + %s149_s6]]  ;;  %s244_s9 = scalar_lea.vmem %s567_s15, 7 [#allocation5] }
  0x90   : > { %s698_s10 = sshll.u32 %s244_s9, 4  ;;  %s164_s10 = int_to_ptr.vmem [resolvable:$true] %s698_s10 }
  0x93   : > { %s134_s19 = scalar_lea.hbm %s729_s1, %s133_s4 }
  0x94   : > { %s143_s27 = sshll.u32 %s134_s19, 4  ;;  %s144_s27 = int_to_ptr.hbm [resolvable:$true] %s143_s27 }
  0x95   : > { %s152_s14 = scalar_lea.hbm %s729_s1, %s695_s7  ;;  %s440_s24 = sshra.s32 %s144_s27, 4  ;;  %s441_s24 = int_to_ptr.hbm [resolvable:$true] %s440_s24 }
  0x96   : > { %s442_s25 = scalar_lea.hbm %s441_s24, 1  ;;  %p445_p5 = scmp.lt.s32.totalorder %s441_s24, %s729_s1 }
  0x97   : > { %p443_p4 = scmp.ne.s32.totalorder %s441_s24, %s442_s25  ;;  %p446_p6 = scmp.lt.s32.totalorder %s596_s8, %s442_s25 }
  0x99   : > { %p447_p7 = por %p446_p6, %p445_p5 }
  0x9b   : > { %p448_p8 = pnand %p447_p7, %p443_p4 }
  0x9d   : > { %451 = shalt.err (!%p448_p8)  }
  0x9e   : > { %s452_s23 = sshra.s32 %s146_s21, 4  ;;  %s453_s23 = int_to_ptr.vmem [resolvable:$true] %s452_s23 }
  0x9f   : > { %s454_s26 = scalar_lea.vmem %s453_s23, 1  ;;  %p457_p10 = scmp.lt.s32.totalorder %s453_s23, [#allocation5] }
  0xa0   : > { %p455_p9 = scmp.ne.s32.totalorder %s453_s23, %s454_s26  ;;  %p458_p11 = scmp.lt.s32.totalorder %s603_s17, %s454_s26 }
  0xa2   : > { %p459_p12 = por %p458_p11, %p457_p10 }
  0xa4   : > { %p460_p13 = pnand %p459_p12, %p455_p9 }
  0xa6   : > { %463 = shalt.err (!%p460_p13)  }
  0xa7   : > { %148 = dma.hbm_to_vmem [thread:$0]  %s144_s27, 16, %s146_s21, [#allocation2] }
  0xa8   : > { %s161_s30 = sshll.u32 %s152_s14, 4  ;;  %s162_s30 = int_to_ptr.hbm [resolvable:$true] %s161_s30 }
  0xa9   : > { %s464_s16 = sshra.s32 %s162_s30, 4  ;;  %s465_s16 = int_to_ptr.hbm [resolvable:$true] %s464_s16 }
  0xaa   : > { %s466_s22 = scalar_lea.hbm %s465_s16, 1  ;;  %p469_p1 = scmp.lt.s32.totalorder %s465_s16, %s729_s1 }
  0xab   : > { %p467_p0 = scmp.ne.s32.totalorder %s465_s16, %s466_s22  ;;  %p470_p2 = scmp.lt.s32.totalorder %s596_s8, %s466_s22 }
  0xad   : > { %p471_p3 = por %p470_p2, %p469_p1 }
  0xaf   : > { %p472_p4 = pnand %p471_p3, %p467_p0 }
  0xb1   : > { %475 = shalt.err (!%p472_p4)  }
  0xb2   : > { %s476_s20 = sshra.s32 %s164_s10, 4  ;;  %s477_s20 = int_to_ptr.vmem [resolvable:$true] %s476_s20 }
  0xb3   : > { %s478_s4 = scalar_lea.vmem %s477_s20, 1  ;;  %p481_p6 = scmp.lt.s32.totalorder %s477_s20, [#allocation5] }
  0xb4   : > { %p479_p5 = scmp.ne.s32.totalorder %s477_s20, %s478_s4  ;;  %p482_p7 = scmp.lt.s32.totalorder %s603_s17, %s478_s4 }
  0xb6   : > { %p483_p8 = por %p482_p7, %p481_p6 }
  0xb8   : > { %p484_p9 = pnand %p483_p8, %p479_p5 }
  0xba   : > { %487 = shalt.err (!%p484_p9)  }
  0xbb   : > { %166 = dma.hbm_to_vmem [thread:$0]  %s162_s30, 16, %s164_s10, [#allocation2] }
  0xbc   : > { %s22_s13 = sadd.s32 1, %s528_s13  }
  0xbd   : > { %p19_p10 = scmp.ge.s32.totalorder %s22_s13, 16  }
  0xbe   :  { %s530_s8 = smov (%p19_p10), 0  }
  0xbf   :  { %21 = sbr.rel (!%p19_p10) target bundleno = 7 (0x7), region = 82 }
  0xc4 LB: > { %522 = dma.done.wait [#allocation2], 128  ;;  %s532_s8 = sphi %s530_s8, %s172_s8  }
  0xc5   : > { %523 = vsyncadd [#allocation2], 4294967168  ;;  %s172_s8 = sadd.s32 1, %s532_s8  }
  0xc6   : > { %p169_p11 = scmp.ge.s32.totalorder %s172_s8, 16  }
  0xc7   :  { %s196_s6 = sshll.u32 (%p169_p11), %s730_s2, 4  ;;  %s536_s7 = smov (%p169_p11), [#allocation5]   ;;  %s197_s6 = int_to_ptr.hbm [resolvable:$true] %s196_s6 }
  0xc8   :  { %171 = sbr.rel (!%p169_p11) target bundleno = 196 (0xc4), region = 93  ;;  %s194_s21 = sshll.u32 (%p169_p11), %s536_s7, 4  ;;  %s195_s21 = int_to_ptr.vmem [resolvable:$true] %s194_s21 }
  0xc9   :  { %s537_s13 = smov (%p169_p11), 128   ;;  %s538_s9 = smov (%p169_p11), 8  }
  0xca   :  { %202 = dma.vmem_to_hbm [thread:$0]  (%p169_p11), %s195_s21, 2048, %s197_s6, [#allocation6], %s537_s13, %s537_s13, %s538_s9  }
  0xcd   :  { %524 = dma.done.wait [#allocation6], 2048  }
  0xce   :  { %525 = vsyncadd [#allocation6], 4294965248 }
  0xcf   :  { %207 = vsyncpa [#allocation6], 1 }
  0xd0   :  { %208 = vsyncmov [#allocation2] }
  0xd3   :  { %s209_s1 = vpop.sfrf %208 }
  0xd4   :  { %p263_p12 = scmp.ne.s32.totalorder %s209_s1, 0 }
  0xd6   :  { %213 = shalt.err (%p263_p12)  }

</bundles_post_ra>
